<compile_context>
chip_gen: v7x
topology: tpu7x:2x2x1
jax: 0.10.0
libtpu: 0.0.40
codegen_flags: <defaults>
</compile_context>

<pallas_src>
import functools

import jax
import jax.numpy as jnp
from jax.experimental import pallas as pl
from jax.experimental.pallas import tpu as pltpu


def _cls_loss_kernel(logits_ref, labels_ref, out_ref, *,
                     n_total, tile_n, tiles_per_part):
    p = pl.program_id(0)          # batch partition (one per TensorCore on v7x)
    i = pl.program_id(1)          # reduction step within the partition

    @pl.when(i == 0)
    def _():
        out_ref[...] = jnp.zeros_like(out_ref)

    x = logits_ref[...].astype(jnp.float32)            # (TILE_N, C) upcast in-kernel
    labels = labels_ref[...]                            # (TILE_N, 1) int32

    # Rows past the true batch size (pad rows of the last / duplicated tile)
    # are only discarded at the final per-row mask: every op before it is
    # per-row, so garbage / Inf / NaN on pad rows never leaks into kept rows.
    # Uses the UNclamped tile index so redundant (clamped) steps contribute 0.
    tile_idx = p * tiles_per_part + i
    row_ids = tile_idx * tile_n + jax.lax.broadcasted_iota(
        jnp.int32, (x.shape[0], 1), 0)
    row_ok = row_ids < n_total                           # (TILE_N, 1) bool

    m = jnp.max(x, axis=-1, keepdims=True)               # (TILE_N, 1)
    xs = x - m
    sum_e = jnp.sum(jnp.exp(xs), axis=-1, keepdims=True)
    cls_ids = jax.lax.broadcasted_iota(jnp.int32, xs.shape, 1)
    picked = jnp.sum(jnp.where(cls_ids == labels, xs, 0.0),
                     axis=-1, keepdims=True)

    # logsumexp(x) - x[label] == log(sum exp(x - m)) - (x[label] - m)
    per_row = jnp.where(row_ok, jnp.log(sum_e) - picked, 0.0)

    # Per-partition partial sum; the (8,128) output block is layout-friendly and
    # every element carries the same running value.  Mean (/N) is in the wrapper.
    out_ref[...] += jnp.sum(per_row)


def _vmem_capacity_bytes():
    try:
        info = pltpu.get_tpu_info()
        cap = getattr(info, "vmem_capacity_bytes", None)
        if cap:
            return int(cap)
    except Exception:
        pass
    return 64 * 1024 * 1024        # conservative (v7x-sized) fallback


def _choose_tile_n(n, c, itemsize, ws_target_bytes):
    # Working set ~= 2 double-buffered native-dtype logits blocks
    #              + ~4 block-sized f32 temporaries (upcast, xs, exp, iota/select).
    bytes_per_row = c * (2 * itemsize + 16)
    tile = ws_target_bytes // max(bytes_per_row, 1)
    if tile >= n:
        return n                                  # single full-shape block
    align = 8 * max(1, 4 // itemsize)             # 8 f32 / 16 bf16 / 32 int8 rows
    tile = max(align, (tile // align) * align)
    if tile >= n:
        return n
    return int(tile)


def cls_loss(predicts, labels, *, tile_n=None):
    """Pallas equivalent of ClsLoss.forward(predicts, batch) with batch[1]=labels."""
    n, c = predicts.shape
    labels2d = labels.astype(jnp.int32).reshape(n, 1)

    # Generation-aware VMEM budget: v5e/v6e = 128 MiB physical, v7x = 64 MiB.
    vmem_cap = _vmem_capacity_bytes()
    if vmem_cap >= 100 * (1 << 20):        # v5e / v6e
        vmem_limit = 96 * (1 << 20)
        ws_target = 60 * (1 << 20)
    else:                                  # v7x (or unknown -> conservative)
        vmem_limit = 48 * (1 << 20)
        ws_target = 34 * (1 << 20)

    if tile_n is None:
        tile_n = _choose_tile_n(n, c, predicts.dtype.itemsize, ws_target)

    total_tiles = pl.cdiv(n, tile_n)
    # Outer "parallel" axis splits the batch across TensorCores (2x on v7x,
    # neutral on single-core v5e/v6e); each partition owns a private partial sum.
    num_parts = 2 if total_tiles >= 2 else 1
    tiles_per_part = pl.cdiv(total_tiles, num_parts)
    last_tile = total_tiles - 1

    def tile_map(p, i):
        # Clamp: the last partition may run one redundant step; its rows are
        # masked out in-kernel via the unclamped global row index.
        t = jnp.minimum(p * tiles_per_part + i, last_tile)
        return (t, 0)

    kernel = functools.partial(_cls_loss_kernel, n_total=n, tile_n=tile_n,
                               tiles_per_part=tiles_per_part)

    cost = pl.CostEstimate(
        flops=5 * n * c,
        transcendentals=n * c + n,                       # exp per element + log per row
        bytes_accessed=(n * c * predicts.dtype.itemsize + n * 4
                        + num_parts * 8 * 128 * 4),
    )

    # TODO(synk): no ignore_index / out-of-range-label handling (matches the
    # default nn.CrossEntropyLoss usage in the reference module).
    out = pl.pallas_call(
        kernel,
        out_shape=jax.ShapeDtypeStruct((num_parts * 8, 128), jnp.float32),
        grid=(num_parts, tiles_per_part),
        in_specs=[
            pl.BlockSpec((tile_n, c), tile_map),         # pipelined logits tile
            pl.BlockSpec((tile_n, 1), tile_map),         # matching labels column
        ],
        out_specs=pl.BlockSpec((8, 128), lambda p, i: (p, 0)),  # per-partition acc
        compiler_params=pltpu.CompilerParams(
            dimension_semantics=("parallel", "arbitrary"),
            vmem_limit_bytes=vmem_limit,
        ),
        cost_estimate=cost,
    )(predicts, labels2d)

    # Per-partition partial sums sit at rows 0, 8, ...; mean over the TRUE N.
    loss = jnp.sum(out[0::8, 0]) / n
    return {"loss": loss}


def _reference(predicts, labels):
    # pure-JAX reference matching torch.nn.CrossEntropyLoss (mean reduction)
    logp = jax.nn.log_softmax(predicts.astype(jnp.float32), axis=-1)
    picked = jnp.take_along_axis(logp, labels.astype(jnp.int32)[:, None], axis=-1)
    return -jnp.mean(picked)


if __name__ == "__main__":
    key = jax.random.PRNGKey(0)
    k_logits, k_labels = jax.random.split(key)

    # Small-but-representative: 20 rows (NOT a multiple of the tile) x 128 classes.
    N, C = 20, 128
    predicts = jax.random.normal(k_logits, (N, C), dtype=jnp.float32)
    labels = jax.random.randint(k_labels, (N,), 0, C, dtype=jnp.int32)

    ref = _reference(predicts, labels)

    # Forced small tile -> multi-step grid: exercises the 2-partition parallel
    # axis, the clamped duplicate tile and the pad-row masking.
    out_tiled = cls_loss(predicts, labels, tile_n=8)
    loss_tiled = jax.block_until_ready(out_tiled["loss"])
    assert jnp.allclose(loss_tiled, ref, atol=1e-5, rtol=1e-5), (loss_tiled, ref)

    # Default auto-sized path (single full-shape block at this small N).
    out_auto = cls_loss(predicts, labels)
    loss_auto = jax.block_until_ready(out_auto["loss"])
    assert jnp.allclose(loss_auto, ref, atol=1e-5, rtol=1e-5), (loss_auto, ref)

    # bf16 logits path: native-dtype HBM read, in-kernel f32 upcast,
    # 16-row (bf16 sublane-packed) tiles.
    predicts_bf16 = predicts.astype(jnp.bfloat16)
    out_bf16 = cls_loss(predicts_bf16, labels, tile_n=16)
    loss_bf16 = jax.block_until_ready(out_bf16["loss"])
    ref_bf16 = _reference(predicts_bf16.astype(jnp.float32), labels)
    assert jnp.allclose(loss_bf16, ref_bf16, atol=1e-3, rtol=1e-3), (loss_bf16, ref_bf16)

    print("KERNEL_OK")
</pallas_src>

<mosaic_0001>
module attributes {stable_mosaic.version = 11 : i64} {
  func.func @_cls_loss_kernel(%arg0: i32, %arg1: i32, %arg2: memref<8x128xf32, #tpu.memory_space<vmem>>, %arg3: memref<8x1xi32, #tpu.memory_space<vmem>>, %arg4: memref<8x128xf32, #tpu.memory_space<vmem>>) attributes {dimension_semantics = [#tpu.dimension_semantics<parallel>, #tpu.dimension_semantics<arbitrary>], iteration_bounds = array<i64: 2, 2>, scalar_prefetch = 0 : i64, scratch_operands = 0 : i64, tpu.core_type = #tpu.core_type<tc>, window_params = [{transform_indices = @transform_0, window_bounds = array<i64: 8, 128>}, {transform_indices = @transform_1, window_bounds = array<i64: 8, 1>}, {transform_indices = @transform_2, window_bounds = array<i64: 8, 128>}]} {
    %c0_i32 = arith.constant 0 : i32
    %0 = arith.cmpi eq, %arg1, %c0_i32 : i32
    %1 = arith.extui %0 : i1 to i32
    %c0_i32_0 = arith.constant 0 : i32
    %2 = arith.cmpi ne, %1, %c0_i32_0 : i32
    scf.if %2 {
      %cst_13 = arith.constant 0.000000e+00 : f32
      %39 = vector.broadcast %cst_13 : f32 to vector<8x128xf32>
      %c0_14 = arith.constant 0 : index
      %c0_15 = arith.constant 0 : index
      %40 = vector.load %arg4[%c0_14, %c0_15] : memref<8x128xf32, #tpu.memory_space<vmem>>, vector<8x128xf32>
      tpu.vector_store %arg4[%c0_14, %c0_15], %39 {strides = array<i32>} : memref<8x128xf32, #tpu.memory_space<vmem>>, vector<8x128xf32>,
    } else {
    }
    %c0 = arith.constant 0 : index
    %c0_1 = arith.constant 0 : index
    %3 = vector.load %arg2[%c0, %c0_1] : memref<8x128xf32, #tpu.memory_space<vmem>>, vector<8x128xf32>
    %c0_2 = arith.constant 0 : index
    %c0_3 = arith.constant 0 : index
    %4 = vector.load %arg3[%c0_2, %c0_3] : memref<8x1xi32, #tpu.memory_space<vmem>>, vector<8x1xi32>
    %c2_i32 = arith.constant 2 : i32
    %5 = arith.muli %arg0, %c2_i32 : i32
    %6 = arith.addi %5, %arg1 : i32
    %c8_i32 = arith.constant 8 : i32
    %7 = arith.muli %6, %c8_i32 : i32
    %8 = tpu.iota {dimensions = array<i32: 0>} : vector<8x1xi32>
    %9 = vector.broadcast %7 : i32 to vector<8x1xi32>
    %10 = arith.addi %9, %8 : vector<8x1xi32>
    %c20_i32 = arith.constant 20 : i32
    %11 = vector.broadcast %c20_i32 : i32 to vector<8x1xi32>
    %12 = arith.cmpi slt, %10, %11 : vector<8x1xi32>
    %cst = arith.constant dense<0xFF800000> : vector<8xf32>
    %13 = vector.multi_reduction <maximumf>, %3, %cst [1] : vector<8x128xf32> to vector<8xf32>
    %14 = vector.shape_cast %13 : vector<8xf32> to vector<8x1xf32>
    %15 = vector.broadcast %14 : vector<8x1xf32> to vector<8x128xf32>
    %16 = arith.subf %3, %15 : vector<8x128xf32>
    %17 = math.exp %16 : vector<8x128xf32>
    %cst_4 = arith.constant dense<0.000000e+00> : vector<8xf32>
    %18 = vector.multi_reduction <add>, %17, %cst_4 [1] : vector<8x128xf32> to vector<8xf32>
    %19 = vector.shape_cast %18 : vector<8xf32> to vector<8x1xf32>
    %20 = tpu.iota {dimensions = array<i32: 1>} : vector<8x128xi32>
    %21 = vector.broadcast %4 : vector<8x1xi32> to vector<8x128xi32>
    %22 = arith.cmpi eq, %20, %21 : vector<8x128xi32>
    %cst_5 = arith.constant 0.000000e+00 : f32
    %23 = vector.broadcast %cst_5 : f32 to vector<8x128xf32>
    %24 = arith.select %22, %16, %23 : vector<8x128xi1>, vector<8x128xf32>
    %cst_6 = arith.constant dense<0.000000e+00> : vector<8xf32>
    %25 = vector.multi_reduction <add>, %24, %cst_6 [1] : vector<8x128xf32> to vector<8xf32>
    %26 = vector.shape_cast %25 : vector<8xf32> to vector<8x1xf32>
    %27 = math.log %19 : vector<8x1xf32>
    %28 = arith.subf %27, %26 : vector<8x1xf32>
    %cst_7 = arith.constant 0.000000e+00 : f32
    %29 = vector.broadcast %cst_7 : f32 to vector<8x1xf32>
    %30 = arith.select %12, %28, %29 : vector<8x1xi1>, vector<8x1xf32>
    %c0_8 = arith.constant 0 : index
    %c0_9 = arith.constant 0 : index
    %31 = vector.load %arg4[%c0_8, %c0_9] : memref<8x128xf32, #tpu.memory_space<vmem>>, vector<8x128xf32>
    %32 = vector.shape_cast %30 : vector<8x1xf32> to vector<1x8x1xf32>
    %cst_10 = arith.constant dense<0.000000e+00> : vector<1xf32>
    %33 = vector.multi_reduction <add>, %32, %cst_10 [1, 2] : vector<1x8x1xf32> to vector<1xf32>
    %34 = vector.shape_cast %33 : vector<1xf32> to vector<1x1x1xf32>
    %35 = vector.extract %34[0, 0, 0] : f32 from vector<1x1x1xf32>
    %36 = vector.broadcast %35 : f32 to vector<8x128xf32>
    %37 = arith.addf %31, %36 : vector<8x128xf32>
    %c0_11 = arith.constant 0 : index
    %c0_12 = arith.constant 0 : index
    %38 = vector.load %arg4[%c0_11, %c0_12] : memref<8x128xf32, #tpu.memory_space<vmem>>, vector<8x128xf32>
    tpu.vector_store %arg4[%c0_11, %c0_12], %37 {strides = array<i32>} : memref<8x128xf32, #tpu.memory_space<vmem>>, vector<8x128xf32>,
    return
  }
  func.func @transform_0(%arg0: i32, %arg1: i32) -> (i32, i32) {
    %c2_i32 = arith.constant 2 : i32
    %0 = arith.muli %arg0, %c2_i32 : i32
    %1 = arith.addi %0, %arg1 : i32
    %c2_i32_0 = arith.constant 2 : i32
    %2 = arith.minsi %1, %c2_i32_0 : i32
    %c0_i32 = arith.constant 0 : i32
    %c0_i32_1 = arith.constant 0 : i32
    return %2, %c0_i32 : i32, i32
  }
  func.func @transform_1(%arg0: i32, %arg1: i32) -> (i32, i32) {
    %c2_i32 = arith.constant 2 : i32
    %0 = arith.muli %arg0, %c2_i32 : i32
    %1 = arith.addi %0, %arg1 : i32
    %c2_i32_0 = arith.constant 2 : i32
    %2 = arith.minsi %1, %c2_i32_0 : i32
    %c0_i32 = arith.constant 0 : i32
    %c0_i32_1 = arith.constant 0 : i32
    return %2, %c0_i32 : i32, i32
  }
  func.func @transform_2(%arg0: i32, %arg1: i32) -> (i32, i32) {
    %c0_i32 = arith.constant 0 : i32
    %c0_i32_0 = arith.constant 0 : i32
    return %arg0, %c0_i32 : i32, i32
  }
}

</mosaic_0001>

<bundles_post_ra>
// kernel: tpu_custom_call.1
= control target key start
LH: loop header
LB: loop body
LE: loop exit
PB: predicated region body
PF: predicated region fallthrough
CT: control target
= control target key end

     0   :  { %7 = vsyncpa [#allocation3], 0  ;;  %s742_s0 = inlined_call_operand.vmem [shape: f32[20,128], index: 0, kind: input, shape index: {}]   ;;  %s743_s1 = inlined_call_operand.vmem [shape: s32[20,1], index: 1, kind: input, shape index: {}]   ;;  %s744_s2 = inlined_call_operand.hbm [shape: f32[16,128], index: 2, kind: output, shape index: {}]  }
   0x1   :  { %9 = vsyncpa [#allocation3 + $0x1], 0  ;;  %s591_s9 = smov 0   ;;  %s593_s10 = smov 0  }
   0x2   :  { %s595_s11 = smov 0   ;;  %s597_s12 = smov 0  }
   0x3   :  { %s599_s13 = smov 0   ;;  %s601_s14 = smov 0  }
   0x4   :  { %s603_s15 = smov 0   ;;  %s605_s16 = smov 0  }
   0x5 LB: > { %s370_s17 = sadd.s32 4294967295, %s571_s16   ;;  %s371_s18 = sadd.s32 4294967294, %s571_s16   ;;  %s571_s16 = sphi %s605_s16, %s15_s16   ;;  %s567_s15 = sphi %s603_s15, %s753_s15   ;;  %s563_s14 = sphi %s601_s14, %s752_s14   ;;  %s559_s13 = sphi %s599_s13, %s751_s13   ;;  %s555_s12 = sphi %s597_s12, %s750_s12   ;;  %s551_s11 = sphi %s595_s11, %s749_s11   ;;  %s547_s10 = sphi %s593_s10, %s748_s10   ;;  %s543_s9 = sphi %s591_s9, %s747_s9  }
   0x6   : > { %s24_s19 = sadd.s32 1, %s563_s14  ;;  %s27_s20 = sadd.s32 1, %s567_s15 }
   0x7   : > { %p25_p0 = scmp.ge.s32.totalorder %s24_s19, 2  ;;  %p112_p1 = scmp.ne.s32.totalorder %s551_s11, %s547_s10 }
   0x8   : > { %p113_p2 = scmp.eq.s32.totalorder %s370_s17, 3  ;;  %p118_p4 = scmp.ne.s32.totalorder %s547_s10, %s543_s9 }
   0x9   : > { %s755_s19 = smov (%p25_p0, %s24_s19), 0  ;;  %s757_s20 = smov (!%p25_p0, %s27_s20), %s567_s15 }
   0xa   : > { %p640_p3 = por %p113_p2, %p112_p1  ;;  %p29_p5 = scmp.ge.s32.totalorder %s757_s20, 2 }
   0xb   : > { %p119_p6 = scmp.eq.s32.totalorder %s371_s18, 3  ;;  %p378_p7 = scmp.ge.s32.totalorder %s571_s16, 1 }
   0xc   : > { %p167_p8 = scmp.lt.s32.totalorder %s571_s16, 5  ;;  %s759_s20 = smov (%p29_p5, %s757_s20), 0 }
   0xd   : > { %p650_p9 = por %p119_p6, %p118_p4  ;;  %s99_s23 = ssub.s32 %s567_s15, %s759_s20 }
   0xe   : > { %p168_p10 = pnand %p378_p7, %p167_p8  ;;  %s102_s24 = sadd.s32 1, %s551_s11 }
   0xf   : > { %p100_p11 = scmp.eq.s32.totalorder %s99_s23, 0  ;;  %s197_s26 = sand.u32 (!%p168_p10), 1, %s547_s10  }
  0x10   : > { %171 = sbr.rel (%p168_p10) target bundleno = 569 (0x239), region = 28  ;;  %s380_s27 = sshll.u32 (!%p168_p10), %s559_s13, 1 }
  0x11   : > { %s658_s25 = scalar_select %p100_p11, %s551_s11, %s102_s24  }
  0x12   : > { %s379_s28 = sshll.u32 (!%p168_p10), %s197_s26, 3  ;;  %s665_s29 = sadd.s32 (!%p168_p10), %s555_s12, %s380_s27 }
  0x13   : > { %p202_p12 = scmp.lt.s32.totalorder (!%p168_p10), %s665_s29, 2  ;;  %s675_s18 = scalar_lea.vmem (!%p168_p10), [#allocation2], %s379_s28 }
  0x14   : > { %p390_p13 = scmp.ne.s32.totalorder (!%p168_p10), %s555_s12, 0 }
  0x17   : > { %s203_s30 = scalar_select %p202_p12, %s665_s29, 2 }
  0x18   : > { %227 = sbr.rel (%p390_p13) target bundleno = 31 (0x1f), region = 32  ;;  %v573_v0 = vmov (!%p390_p13), 0.0  }
  0x19   : > { %s761_s30 = smov (!%p202_p12, %s203_s30), 2  ;;  %228 = vst [vmem:[%s675_s18] sm:$0xff] (!%p390_p13), %v573_v0 }
  0x1a   : > { %s384_s3 = sshll.u32 %s761_s30, 3 }
  0x1b   : > { %s207_s6 = scalar_lea.vmem %s742_s0, %s384_s3  ;;  %s219_s17 = scalar_lea.vmem %s743_s1, %s384_s3 }
  0x1f PF: > { %v229_v1 = vld [vmem:[%s207_s6] sm:$0xff]  ;;  %v574_v2 = vmov 0   ;;  %v234_v7 = vlaneseq  ;;  %s392_s12 = sshll.u32 %s665_s29, 3  ;;  %vm260_vm2 = vcmask 7168   ;;  %s394_s23 = sshll.u32 %s559_s13, 7 }
  0x20   : > { %239 = vmax.xlane.f32.xlu0 %v229_v1  ;;  %v230_v3 = vld [vmem:[%s219_s17] sm:$0xff]  ;;  %v236_v14 = vstv %s392_s12  ;;  %s288_s24 = sshll.u32 %s675_s18, 4  ;;  %s686_s30 = scalar_lea.hbm %s744_s2, %s394_s23  ;;  %s688_s24 = int_to_ptr.vmem [resolvable:$true] %s288_s24 }
  0x21   : > { %472 = vset.pattern.permute.xlu0 %v574_v2  ;;  %v247_v8 = vand.u32 127, %v234_v7  ;;  %v235_v13 = vshrl.u32 %v234_v7, 7  ;;  %v259_v29 = vld [vmem:[%s675_s18] sm:$0xff]  ;;  %s275_s3 = scalar_lea.sflag [#allocation3], %s197_s26  ;;  %s477_s4 = scalar_lea.vmem %s688_s24, 128 }
  0x22   : > { %p478_p0 = scmp.ne.s32.totalorder %s688_s24, %s477_s4  ;;  %s575_s13 = smov [#allocation2]  }
  0x23   : > { %v237_v15 = vadd.s32 %v236_v14, %v235_v13  ;;  %s481_s5 = sshll.u32 %s575_s13, 4  ;;  %s482_s5 = int_to_ptr.vmem [resolvable:$false] %s481_s5 }
  0x24   : > { %p479_p1 = pnand %p478_p0, %p640_p3  ;;  %s483_s6 = scalar_lea.vmem %s482_s5, 256 }
  0x25   : > { %vm238_vm1 = vcmp.lt.s32.totalorder %v237_v15, 20  ;;  %p484_p4 = scmp.lt.s32.totalorder %s688_s24, %s482_s5  ;;  %p485_p5 = scmp.lt.s32.totalorder %s483_s6, %s477_s4 }
  0x26   : > { %p480_p2 = pneg %p479_p1 }
  0x27   : > { %p486_p6 = por %p485_p5, %p484_p4 }
  0x29   : > { %p487_p7 = pnand %p486_p6, %p480_p2 }
  0x36   : > { %249 = vperm.xlu0 %472, %v230_v3  }
  0xad   : > { %v240_v4 = vpop.xlane.xlu0 %239 }
  0xae   : > { %v241_v5 = vsub.f32 %v229_v1, %v240_v4 }
  0xb0   : > { %v242_v6 = vmul.f32 1.442695, %v241_v5 }
  0xb2   : > { %473 = vpow2.f32 %v242_v6 }
  0xb5   : > { %v250_v9 = vpop.permute.xlu0 %249 }
  0xb6   : > { %vm251_vm0 = vcmp.eq.s32.totalorder %v247_v8, %v250_v9 }
  0xb7   : > { %v252_v11 = vsel %vm251_vm0, %v241_v5, 0.0 }
  0xbc   : > { %v474_v10 = vpop.eup %473 }
  0xbd   : > { %244 = vadd.xlane.f32.xlu1 %v474_v10 }
  0xc1   : > { %253 = vadd.xlane.f32.xlu1 %v252_v11 }
 0x14a   : > { %v245_v12 = vpop.xlane.xlu1 %244 }
 0x14b   : > { %475 = vlog2.f32 %v245_v12 }
 0x14e   : > { %v254_v18 = vpop.xlane.xlu1 %253 }
 0x155   : > { %v476_v16 = vpop.eup %475 }
 0x156   : > { %v256_v17 = vmul.f32 0.6931472, %v476_v16 }
 0x158   : > { %v257_v19 = vsub.f32 %v256_v17, %v254_v18 }
 0x15a   : > { %v258_v20 = vsel %vm238_vm1, %v257_v19, 0.0 }
 0x15b   : > { %v261_v21 = vsel %vm260_vm2, %v258_v20, 0.0 }
 0x15c   : > { %262 = vadd.xlane.f32.xlu1 %v261_v21 }
 0x1e9   : > { %v263_v22 = vpop.xlane.xlu1 %262 }
 0x1ea   : > { %v264_v23 = vrot.slane %v263_v22, 4 }
 0x1ec   : > { %v265_v24 = vadd.f32 %v264_v23, %v263_v22 }
 0x1ee   : > { %v266_v25 = vrot.slane %v265_v24, 2 }
 0x1f0   : > { %v267_v26 = vadd.f32 %v266_v25, %v265_v24 }
 0x1f2   : > { %v268_v27 = vrot.slane %v267_v26, 1 }
 0x1f4   : > { %v269_v28 = vadd.f32 %v268_v27, %v267_v26 }
 0x1f6   : > { %397 = vpush %v269_v28 }
 0x227   : > { %s398_s27 = spop %397 }
 0x228   : > { %v271_v30 = vstv %s398_s27 }
 0x229   : > { %v272_v31 = vadd.f32 %v271_v30, %v259_v29 }
 0x22b   : > { %273 = vst [vmem:[%s675_s18] sm:$0xff] %v272_v31 }
 0x22c   : > { %490 = shalt.err (!%p487_p7)
}
 0x22d   : > { %s491_s26 = scalar_lea.hbm %s686_s30, 128  ;;  %s495_s17 = scalar_lea.hbm %s744_s2, 256 }
 0x22e   : > { %p492_p8 = scmp.ne.s32.totalorder %s686_s30, %s491_s26  ;;  %p496_p12 = scmp.lt.u32.totalorder %s686_s30, %s744_s2 }
 0x22f   : > { %p497_p13 = scmp.lt.u32.totalorder %s495_s17, %s491_s26  ;;  %p499_p1 = scmp.lt.u32.totalorder %s491_s26, %s686_s30 }
 0x230   : > { %p493_p10 = pnand %p492_p8, %p640_p3 }
 0x231   : > { %p498_p0 = por %p497_p13, %p496_p12 }
 0x232   : > { %p494_p11 = pneg %p493_p10 }
 0x233   : > { %p500_p2 = por %p499_p1, %p498_p0 }
 0x235   : > { %p501_p4 = pnand %p500_p2, %p494_p11 }
 0x237   : > { %504 = shalt.err (!%p501_p4)
}
 0x238   : > { %399 = dma.vmem_to_hbm [thread:$0]  (%p640_p3), %s688_s24, 128, %s686_s30, %s275_s3  }
 0x239 PF: > { %p405_p5 = scmp.ge.s32.totalorder %s571_s16, 2  ;;  %s300_s23 = sand.u32 1, %s543_s9  }
 0x23a   : > { %s301_s27 = scalar_lea.sflag [#allocation3], %s300_s23 }
 0x23b   : > { %p402_p6 = pnand %p405_p5, %p650_p9 }
 0x23d   : > { %538 = dma.done.wait (!%p402_p6), %s301_s27, 128  }
 0x23e   : > { %540 = vsyncadd (!%p402_p6), %s301_s27, 4294967168  ;;  %s15_s16 = sadd.s32 1, %s571_s16   ;;  %s747_s9 = smov %s547_s10 }
 0x23f   : > { %p12_p7 = scmp.ge.s32.totalorder %s15_s16, 6   ;;  %s748_s10 = smov %s551_s11 }
 0x240   : > { %s749_s11 = smov %s658_s25  ;;  %s750_s12 = smov %s563_s14 }
 0x241   : > { %s751_s13 = smov %s567_s15  ;;  %s752_s14 = smov %s755_s19 }
 0x242   : > { %s753_s15 = smov %s759_s20  ;;  %14 = sbr.rel (!%p12_p7) target bundleno = 5 (0x5), region = 70 }
 0x249   :  { %306 = vsyncpa [#allocation3], 1 }
 0x24a   :  { %308 = vsyncpa [#allocation3 + $0x1], 1 }

</bundles_post_ra>
